<compile_context>
chip_gen: v7x
topology: tpu7x:2x2x1
jax: 0.10.0
libtpu: 0.0.40
codegen_flags: <defaults>
</compile_context>

<pallas_src>
import functools

import jax
import jax.numpy as jnp
from jax import lax
from jax.experimental import pallas as pl
from jax.experimental.pallas import tpu as pltpu


def _round_up(x, m):
    return ((x + m - 1) // m) * m


def _cdiv(a, b):
    return -(-a // b)


def _tpu_defaults():
    """Generation-aware defaults: (vmem_budget_bytes, vmem_cap_bytes, num_splits)."""
    kind = ""
    try:
        kind = (jax.devices()[0].device_kind or "").lower()
    except Exception:
        pass
    if "7" in kind:                        # v7x: 64 MiB VMEM per TC, 2 TCs/chip
        return 40 << 20, 48 << 20, 2
    if ("v5" in kind) or ("v6" in kind):   # v5e / v6e: 128 MiB VMEM, 1 TC/chip
        return 96 << 20, 100 << 20, 1
    return 40 << 20, 48 << 20, 1           # unknown: conservative (v7x-safe)


def _choose_tile_n(N, M, L, h_itemsize, vmem_budget_bytes):
    """Largest 8-multiple row tile whose double-buffered H block plus resident
    fused weights / f32 gate activations fits the generation-aware VMEM budget."""
    resident = 2 * (M * 2 * L * h_itemsize) + 8 * M * 4 + 64 * 1024
    per_row = 2 * M * h_itemsize + 4 * (2 * L) * 4
    avail = max(vmem_budget_bytes - resident, 1 << 20)
    tile = int(max(8, min(avail // per_row, 4096)))
    tile -= tile % 8
    return max(tile, 8)


def prepack_params(params, compute_dtype=jnp.bfloat16):
    """One-time fusion / casting of the gate weights (hoist out of the hot path)."""
    L = params["W_V"].shape[1]
    w_vu = jnp.concatenate([params["W_V"], params["W_U"]], axis=1).astype(compute_dtype)
    b_vu = jnp.concatenate([params["b_V"], params["b_U"]], axis=1).astype(jnp.float32)
    w_row = params["W_w"].reshape(1, L).astype(jnp.float32)
    # b_w intentionally dropped: softmax over instances is shift-invariant.
    return {"w_vu": w_vu, "b_vu": b_vu, "w_row": w_row, "L": L,
            "compute_dtype": compute_dtype}


def _abmil_kernel(N, L, steps, ragged,
                  h_ref, wvu_ref, bvu_ref, ww_ref,
                  m_out_ref, l_out_ref, acc_out_ref,
                  m_ref, l_ref, acc_ref):
    c = pl.program_id(0)    # TensorCore split (parallel axis)
    i = pl.program_id(1)    # streaming step within the split (reduction axis)
    tile_n = h_ref.shape[0]

    @pl.when(i == 0)
    def _init():
        m_ref[...] = jnp.full_like(m_ref, -jnp.inf)
        l_ref[...] = jnp.zeros_like(l_ref)
        acc_ref[...] = jnp.zeros_like(acc_ref)

    h_tile = h_ref[...]                               # (tile_n, M) compute dtype

    # Fused gate projection: one lane-dense MXU matmul, f32 accumulation.
    g = jnp.dot(h_tile, wvu_ref[...], preferred_element_type=jnp.float32)
    g = g + bvu_ref[...]                              # (tile_n, 2L) f32
    a_v = jnp.tanh(g[:, :L])
    a_u = jax.nn.sigmoid(g[:, L:])
    gated = a_v * a_u                                 # (tile_n, L) f32

    # Attention logits: VPU multiply + lane reduce (avoid a 1-lane MXU output).
    logits = jnp.sum(gated * ww_ref[...], axis=-1, keepdims=True)   # (tile_n, 1)

    if ragged:
        # H was zero-padded in the wrapper, so only this cheap (tile_n, 1) mask
        # is needed (pad rows must not contribute to the softmax denominator).
        rows = (c * steps + i) * tile_n + lax.broadcasted_iota(jnp.int32, (tile_n, 1), 0)
        valid = rows < N
        logits = jnp.where(valid, logits, -jnp.inf)

    # Online (flash-style) softmax update; partials stay unnormalized and are
    # combined across splits in the wrapper.
    m_prev = m_ref[...]                                              # (1, 1)
    m_new = jnp.maximum(m_prev, jnp.max(logits, axis=0, keepdims=True))
    # Guard the all-masked-tile case (m_new == -inf): exp(-inf - -inf) = nan.
    corr = jnp.where(m_new == -jnp.inf, 0.0, jnp.exp(m_prev - m_new))
    p = jnp.exp(logits - m_new)                                      # (tile_n, 1)
    if ragged:
        p = jnp.where(valid, p, 0.0)
    l_ref[...] = corr * l_ref[...] + jnp.sum(p, axis=0, keepdims=True)

    # Weighted pooling on the MXU: contraction over the N-tile -> (1, M).
    contrib = lax.dot_general(
        p.astype(h_tile.dtype), h_tile,
        dimension_numbers=(((0,), (0,)), ((), ())),
        preferred_element_type=jnp.float32,
    )
    acc_ref[...] = corr * acc_ref[...] + contrib
    m_ref[...] = m_new

    @pl.when(i == pl.num_programs(1) - 1)
    def _finalize():
        m_out_ref[...] = m_ref[...].reshape(m_out_ref.shape)
        l_out_ref[...] = l_ref[...].reshape(l_out_ref.shape)
        acc_out_ref[...] = acc_ref[...].reshape(acc_out_ref.shape)


def abmil_forward(H, params=None, *, prepacked=None, tile_n=None,
                  compute_dtype=jnp.bfloat16, num_splits=None):
    """H: (N, M). params: dict with W_V/W_U (M, L), b_V/b_U (1, L), W_w (L, 1), b_w (1, 1).

    Returns Z: (1, M) float32."""
    N, M = H.shape
    if prepacked is None:
        prepacked = prepack_params(params, compute_dtype)
    compute_dtype = prepacked["compute_dtype"]
    w_vu, b_vu, w_row, L = (prepacked["w_vu"], prepacked["b_vu"],
                            prepacked["w_row"], prepacked["L"])
    itemsize = jnp.dtype(compute_dtype).itemsize

    vmem_budget, vmem_cap, default_splits = _tpu_defaults()
    if num_splits is None:
        num_splits = default_splits

    if tile_n is None:
        tile_n = _choose_tile_n(N, M, L, itemsize, vmem_budget)
    tile_n = int(min(int(tile_n), _round_up(N, 8)))
    tile_n = max(8, tile_n - tile_n % 8)               # (8,128) sublane rule

    grid_n = _cdiv(N, tile_n)
    splits = max(1, min(int(num_splits), grid_n))      # each split gets >=1 real tile
    steps = _cdiv(grid_n, splits)
    n_pad = splits * steps * tile_n
    ragged = n_pad != N

    h = H.astype(compute_dtype)
    if ragged:
        # One-time zero pad: pooling matmul sees finite zeros; only the cheap
        # in-kernel logits mask is needed for correctness of the softmax.
        h = jnp.pad(h, ((0, n_pad - N), (0, 0)))

    # Scoped-VMEM estimate (double-buffered H tile dominates), clamped to a
    # generation-aware cap so the same kernel fits v7x's 64 MiB physical VMEM.
    vmem_est = (2 * tile_n * M * itemsize              # H tile (double-buffered)
                + 2 * M * 2 * L * itemsize             # fused gate weights
                + 4 * tile_n * 2 * L * 4               # f32 gate activations
                + 8 * M * 4 + 64 * 1024)               # acc / partial outs / biases
    vmem_limit = int(min(vmem_cap, max(16 << 20, 2 * vmem_est)))

    kernel = functools.partial(_abmil_kernel, N, L, steps, ragged)

    m_p, l_p, acc_p = pl.pallas_call(
        kernel,
        out_shape=(
            jax.ShapeDtypeStruct((splits, 1, 1), jnp.float32),   # running max
            jax.ShapeDtypeStruct((splits, 1, 1), jnp.float32),   # running sum
            jax.ShapeDtypeStruct((splits, 1, M), jnp.float32),   # weighted H rows
        ),
        grid=(splits, steps),
        in_specs=[
            pl.BlockSpec((tile_n, M), lambda c, i: (c * steps + i, 0)),  # H stream
            pl.BlockSpec((M, 2 * L), lambda c, i: (0, 0)),   # fused gate weights
            pl.BlockSpec((1, 2 * L), lambda c, i: (0, 0)),   # fused gate biases
            pl.BlockSpec((1, L), lambda c, i: (0, 0)),       # w_w as lane-dense row
        ],
        out_specs=(
            pl.BlockSpec((1, 1, 1), lambda c, i: (c, 0, 0)),
            pl.BlockSpec((1, 1, 1), lambda c, i: (c, 0, 0)),
            pl.BlockSpec((1, 1, M), lambda c, i: (c, 0, 0)),
        ),
        scratch_shapes=[
            pltpu.VMEM((1, 1), jnp.float32),   # running max m (per core)
            pltpu.VMEM((1, 1), jnp.float32),   # running sum l (per core)
            pltpu.VMEM((1, M), jnp.float32),   # running weighted sum of H rows
        ],
        compiler_params=pltpu.CompilerParams(
            dimension_semantics=("parallel", "arbitrary"),   # TC split x reduction
            vmem_limit_bytes=vmem_limit,
        ),
    )(h, w_vu, b_vu, w_row)

    # Tiny flash-style combine of the per-split partials (O(splits * M)).
    m_p = m_p[:, 0, :]                                  # (splits, 1)
    l_p = l_p[:, 0, :]                                  # (splits, 1)
    acc_p = acc_p[:, 0, :]                              # (splits, M)
    m_max = jnp.max(m_p, axis=0, keepdims=True)         # (1, 1)
    scale = jnp.exp(m_p - m_max)                        # all-pad split -> exp(-inf)=0
    denom = jnp.sum(scale * l_p, axis=0, keepdims=True)
    z = jnp.sum(scale * acc_p, axis=0, keepdims=True) / denom
    return z


def init_params(key, M, L):
    """Deterministic init mimicking PyTorch nn.Linear default (U[-1/sqrt(fan_in), +])."""
    ks = jax.random.split(key, 6)

    def lin(kw, kb, fan_in, fan_out):
        bound = 1.0 / jnp.sqrt(fan_in)
        # stored as (in, out) so the kernel / reference do H @ W
        W = jax.random.uniform(kw, (fan_in, fan_out), jnp.float32, -bound, bound)
        b = jax.random.uniform(kb, (1, fan_out), jnp.float32, -bound, bound)
        return W, b

    W_V, b_V = lin(ks[0], ks[1], M, L)
    W_U, b_U = lin(ks[2], ks[3], M, L)
    W_w, b_w = lin(ks[4], ks[5], L, 1)
    return {"W_V": W_V, "b_V": b_V, "W_U": W_U, "b_U": b_U, "W_w": W_w, "b_w": b_w}


def abmil_reference(H, p):
    """Pure-JAX f32 reference (matches the PyTorch module, incl. b_w)."""
    hp = lax.Precision.HIGHEST
    a_v = jnp.tanh(jnp.dot(H, p["W_V"], precision=hp) + p["b_V"])
    a_u = jax.nn.sigmoid(jnp.dot(H, p["W_U"], precision=hp) + p["b_U"])
    A = jnp.dot(a_v * a_u, p["W_w"], precision=hp) + p["b_w"]   # (N, 1)
    A = jax.nn.softmax(A.T, axis=1)                             # (1, N)
    return jnp.dot(A, H, precision=hp)                          # (1, M)


if __name__ == "__main__":
    # Small shapes consistent with the module: a bag of N instances of dim M.
    M, L = 32, 32
    key = jax.random.PRNGKey(0)
    k_h, k_p = jax.random.split(key)
    params = init_params(k_p, M, L)

    N = 64
    H = jax.random.normal(k_h, (N, M), jnp.float32)
    Z_ref = abmil_reference(H, params)

    # Case 1: f32, single split, multi-tile streaming pipeline.
    Z1 = jax.block_until_ready(
        abmil_forward(H, params, tile_n=16, compute_dtype=jnp.float32, num_splits=1))
    assert Z1.shape == (1, M)
    assert jnp.allclose(Z1, Z_ref, atol=3e-5, rtol=3e-5), "f32 single-split mismatch"

    # Case 2: f32, dual split (v7x-style parallel axis; runs sequentially on
    # single-TC chips) with ragged N -> wrapper zero-pad + in-kernel logit mask.
    H2 = H[:50]
    Z2 = jax.block_until_ready(
        abmil_forward(H2, params, tile_n=16, compute_dtype=jnp.float32, num_splits=2))
    Z2_ref = abmil_reference(H2, params)
    assert jnp.allclose(Z2, Z2_ref, atol=3e-5, rtol=3e-5), "ragged dual-split mismatch"

    # Case 3: default fast path - bf16 streaming of H / fused gate weights.
    Z3 = jax.block_until_ready(abmil_forward(H, params, tile_n=16, num_splits=2))
    assert jnp.allclose(Z3, Z_ref, atol=2e-2, rtol=2e-2), "bf16 mismatch vs reference"

    # Case 4: fully automatic config (auto tile_n, generation-aware splits/VMEM).
    Z4 = jax.block_until_ready(abmil_forward(H, params))
    assert jnp.allclose(Z4, Z_ref, atol=2e-2, rtol=2e-2), "auto-config mismatch"

    print("KERNEL_OK")
</pallas_src>

<mosaic_0001>
module attributes {stable_mosaic.version = 11 : i64} {
  func.func @_abmil_kernel(%arg0: i32, %arg1: i32, %arg2: memref<16x32xf32, #tpu.memory_space<vmem>>, %arg3: memref<32x64xf32, #tpu.memory_space<vmem>>, %arg4: memref<1x64xf32, #tpu.memory_space<vmem>>, %arg5: memref<1x32xf32, #tpu.memory_space<vmem>>, %arg6: memref<1x1x1xf32, #tpu.memory_space<vmem>>, %arg7: memref<1x1x1xf32, #tpu.memory_space<vmem>>, %arg8: memref<1x1x32xf32, #tpu.memory_space<vmem>>, %arg9: memref<1x1xf32, #tpu.memory_space<vmem>>, %arg10: memref<1x1xf32, #tpu.memory_space<vmem>>, %arg11: memref<1x32xf32, #tpu.memory_space<vmem>>) attributes {dimension_semantics = [#tpu.dimension_semantics<parallel>, #tpu.dimension_semantics<arbitrary>], iteration_bounds = array<i64: 1, 4>, scalar_prefetch = 0 : i64, scratch_operands = 3 : i64, tpu.core_type = #tpu.core_type<tc>, window_params = [{transform_indices = @transform_0, window_bounds = array<i64: 16, 32>}, {pipeline_mode = #tpu.pipeline_mode<synchronous>, transform_indices = @transform_1, window_bounds = array<i64: 32, 64>}, {pipeline_mode = #tpu.pipeline_mode<synchronous>, transform_indices = @transform_2, window_bounds = array<i64: 1, 64>}, {pipeline_mode = #tpu.pipeline_mode<synchronous>, transform_indices = @transform_3, window_bounds = array<i64: 1, 32>}, {transform_indices = @transform_4, window_bounds = array<i64: 1, 1, 1>}, {transform_indices = @transform_5, window_bounds = array<i64: 1, 1, 1>}, {transform_indices = @transform_6, window_bounds = array<i64: 1, 1, 32>}]} {
    %c0_i32 = arith.constant 0 : i32
    %0 = arith.cmpi eq, %arg1, %c0_i32 : i32
    %1 = arith.extui %0 : i1 to i32
    %c0_i32_0 = arith.constant 0 : i32
    %2 = arith.cmpi ne, %1, %c0_i32_0 : i32
    scf.if %2 {
      %cst_28 = arith.constant 0xFF800000 : f32
      %52 = vector.broadcast %cst_28 : f32 to vector<1x1xf32>
      %c0_29 = arith.constant 0 : index
      %c0_30 = arith.constant 0 : index
      %53 = vector.load %arg9[%c0_29, %c0_30] : memref<1x1xf32, #tpu.memory_space<vmem>>, vector<1x1xf32>
      tpu.vector_store %arg9[%c0_29, %c0_30], %52 {strides = array<i32>} : memref<1x1xf32, #tpu.memory_space<vmem>>, vector<1x1xf32>,
      %cst_31 = arith.constant 0.000000e+00 : f32
      %54 = vector.broadcast %cst_31 : f32 to vector<1x1xf32>
      %c0_32 = arith.constant 0 : index
      %c0_33 = arith.constant 0 : index
      %55 = vector.load %arg10[%c0_32, %c0_33] : memref<1x1xf32, #tpu.memory_space<vmem>>, vector<1x1xf32>
      tpu.vector_store %arg10[%c0_32, %c0_33], %54 {strides = array<i32>} : memref<1x1xf32, #tpu.memory_space<vmem>>, vector<1x1xf32>,
      %cst_34 = arith.constant 0.000000e+00 : f32
      %56 = vector.broadcast %cst_34 : f32 to vector<1x32xf32>
      %c0_35 = arith.constant 0 : index
      %c0_36 = arith.constant 0 : index
      %57 = vector.load %arg11[%c0_35, %c0_36] : memref<1x32xf32, #tpu.memory_space<vmem>>, vector<1x32xf32>
      tpu.vector_store %arg11[%c0_35, %c0_36], %56 {strides = array<i32>} : memref<1x32xf32, #tpu.memory_space<vmem>>, vector<1x32xf32>,
    } else {
    }
    %c0 = arith.constant 0 : index
    %c0_1 = arith.constant 0 : index
    %3 = vector.load %arg2[%c0, %c0_1] : memref<16x32xf32, #tpu.memory_space<vmem>>, vector<16x32xf32>
    %c0_2 = arith.constant 0 : index
    %c0_3 = arith.constant 0 : index
    %4 = vector.load %arg3[%c0_2, %c0_3] : memref<32x64xf32, #tpu.memory_space<vmem>>, vector<32x64xf32>
    %cst = arith.constant dense<0.000000e+00> : vector<16x64xf32>
    %5 = tpu.matmul %3, %4, %cst {dimension_numbers = #tpu.dot_dimension_numbers<[1], [0], [0], [1], [0, 0, 1, 1], [], []>} : vector<16x32xf32>, vector<32x64xf32>, vector<16x64xf32> -> vector<16x64xf32>
    %c0_4 = arith.constant 0 : index
    %c0_5 = arith.constant 0 : index
    %6 = vector.load %arg4[%c0_4, %c0_5] : memref<1x64xf32, #tpu.memory_space<vmem>>, vector<1x64xf32>
    %7 = vector.broadcast %6 : vector<1x64xf32> to vector<16x64xf32>
    %8 = arith.addf %5, %7 : vector<16x64xf32>
    %9 = vector.extract_strided_slice %8 {offsets = [0, 0], sizes = [16, 32], strides = [1, 1]} : vector<16x64xf32> to vector<16x32xf32>
    %10 = math.tanh %9 : vector<16x32xf32>
    %11 = vector.extract_strided_slice %8 {offsets = [0, 32], sizes = [16, 32], strides = [1, 1]} : vector<16x64xf32> to vector<16x32xf32>
    %12 = arith.negf %11 : vector<16x32xf32>
    %13 = math.exp %12 : vector<16x32xf32>
    %cst_6 = arith.constant 1.000000e+00 : f32
    %14 = vector.broadcast %cst_6 : f32 to vector<16x32xf32>
    %15 = arith.addf %14, %13 : vector<16x32xf32>
    %16 = arith.divf %14, %15 : vector<16x32xf32>
    %17 = arith.mulf %10, %16 : vector<16x32xf32>
    %c0_7 = arith.constant 0 : index
    %c0_8 = arith.constant 0 : index
    %18 = vector.load %arg5[%c0_7, %c0_8] : memref<1x32xf32, #tpu.memory_space<vmem>>, vector<1x32xf32>
    %19 = vector.broadcast %18 : vector<1x32xf32> to vector<16x32xf32>
    %20 = arith.mulf %17, %19 : vector<16x32xf32>
    %cst_9 = arith.constant dense<0.000000e+00> : vector<16xf32>
    %21 = vector.multi_reduction <add>, %20, %cst_9 [1] : vector<16x32xf32> to vector<16xf32>
    %22 = vector.shape_cast %21 : vector<16xf32> to vector<16x1xf32>
    %c0_10 = arith.constant 0 : index
    %c0_11 = arith.constant 0 : index
    %23 = vector.load %arg9[%c0_10, %c0_11] : memref<1x1xf32, #tpu.memory_space<vmem>>, vector<1x1xf32>
    %cst_12 = arith.constant dense<0xFF800000> : vector<1xf32>
    %24 = vector.multi_reduction <maximumf>, %22, %cst_12 [0] : vector<16x1xf32> to vector<1xf32>
    %25 = vector.shape_cast %24 : vector<1xf32> to vector<1x1xf32>
    %26 = arith.maximumf %23, %25 : vector<1x1xf32>
    %cst_13 = arith.constant 0xFF800000 : f32
    %27 = vector.broadcast %cst_13 : f32 to vector<1x1xf32>
    %28 = arith.cmpf oeq, %26, %27 : vector<1x1xf32>
    %29 = arith.subf %23, %26 : vector<1x1xf32>
    %30 = math.exp %29 : vector<1x1xf32>
    %cst_14 = arith.constant 0.000000e+00 : f32
    %31 = vector.broadcast %cst_14 : f32 to vector<1x1xf32>
    %32 = arith.select %28, %31, %30 : vector<1x1xi1>, vector<1x1xf32>
    %33 = vector.broadcast %26 : vector<1x1xf32> to vector<16x1xf32>
    %34 = arith.subf %22, %33 : vector<16x1xf32>
    %35 = math.exp %34 : vector<16x1xf32>
    %c0_15 = arith.constant 0 : index
    %c0_16 = arith.constant 0 : index
    %36 = vector.load %arg10[%c0_15, %c0_16] : memref<1x1xf32, #tpu.memory_space<vmem>>, vector<1x1xf32>
    %37 = arith.mulf %32, %36 : vector<1x1xf32>
    %cst_17 = arith.constant dense<0.000000e+00> : vector<1xf32>
    %38 = vector.multi_reduction <add>, %35, %cst_17 [0] : vector<16x1xf32> to vector<1xf32>
    %39 = vector.shape_cast %38 : vector<1xf32> to vector<1x1xf32>
    %40 = arith.addf %37, %39 : vector<1x1xf32>
    %c0_18 = arith.constant 0 : index
    %c0_19 = arith.constant 0 : index
    %41 = vector.load %arg10[%c0_18, %c0_19] : memref<1x1xf32, #tpu.memory_space<vmem>>, vector<1x1xf32>
    tpu.vector_store %arg10[%c0_18, %c0_19], %40 {strides = array<i32>} : memref<1x1xf32, #tpu.memory_space<vmem>>, vector<1x1xf32>,
    %cst_20 = arith.constant dense<0.000000e+00> : vector<1x32xf32>
    %42 = tpu.matmul %35, %3, %cst_20 {dimension_numbers = #tpu.dot_dimension_numbers<[0], [0], [1], [1], [0, 1, 1, 1], [], []>} : vector<16x1xf32>, vector<16x32xf32>, vector<1x32xf32> -> vector<1x32xf32>
    %c0_21 = arith.constant 0 : index
    %c0_22 = arith.constant 0 : index
    %43 = vector.load %arg11[%c0_21, %c0_22] : memref<1x32xf32, #tpu.memory_space<vmem>>, vector<1x32xf32>
    %44 = vector.broadcast %32 : vector<1x1xf32> to vector<1x32xf32>
    %45 = arith.mulf %44, %43 : vector<1x32xf32>
    %46 = arith.addf %45, %42 : vector<1x32xf32>
    %c0_23 = arith.constant 0 : index
    %c0_24 = arith.constant 0 : index
    %47 = vector.load %arg11[%c0_23, %c0_24] : memref<1x32xf32, #tpu.memory_space<vmem>>, vector<1x32xf32>
    tpu.vector_store %arg11[%c0_23, %c0_24], %46 {strides = array<i32>} : memref<1x32xf32, #tpu.memory_space<vmem>>, vector<1x32xf32>,
    %c0_25 = arith.constant 0 : index
    %c0_26 = arith.constant 0 : index
    %48 = vector.load %arg9[%c0_25, %c0_26] : memref<1x1xf32, #tpu.memory_space<vmem>>, vector<1x1xf32>
    tpu.vector_store %arg9[%c0_25, %c0_26], %26 {strides = array<i32>} : memref<1x1xf32, #tpu.memory_space<vmem>>, vector<1x1xf32>,
    %c3_i32 = arith.constant 3 : i32
    %49 = arith.cmpi eq, %arg1, %c3_i32 : i32
    %50 = arith.extui %49 : i1 to i32
    %c0_i32_27 = arith.constant 0 : i32
    %51 = arith.cmpi ne, %50, %c0_i32_27 : i32
    scf.if %51 {
      %c0_28 = arith.constant 0 : index
      %c0_29 = arith.constant 0 : index
      %52 = vector.load %arg9[%c0_28, %c0_29] : memref<1x1xf32, #tpu.memory_space<vmem>>, vector<1x1xf32>
      %53 = vector.shape_cast %52 : vector<1x1xf32> to vector<1x1x1xf32>
      %c0_30 = arith.constant 0 : index
      %c0_31 = arith.constant 0 : index
      %c0_32 = arith.constant 0 : index
      %54 = vector.load %arg6[%c0_30, %c0_31, %c0_32] : memref<1x1x1xf32, #tpu.memory_space<vmem>>, vector<1x1x1xf32>
      tpu.vector_store %arg6[%c0_30, %c0_31, %c0_32], %53 {strides = array<i32>} : memref<1x1x1xf32, #tpu.memory_space<vmem>>, vector<1x1x1xf32>,
      %c0_33 = arith.constant 0 : index
      %c0_34 = arith.constant 0 : index
      %55 = vector.load %arg10[%c0_33, %c0_34] : memref<1x1xf32, #tpu.memory_space<vmem>>, vector<1x1xf32>
      %56 = vector.shape_cast %55 : vector<1x1xf32> to vector<1x1x1xf32>
      %c0_35 = arith.constant 0 : index
      %c0_36 = arith.constant 0 : index
      %c0_37 = arith.constant 0 : index
      %57 = vector.load %arg7[%c0_35, %c0_36, %c0_37] : memref<1x1x1xf32, #tpu.memory_space<vmem>>, vector<1x1x1xf32>
      tpu.vector_store %arg7[%c0_35, %c0_36, %c0_37], %56 {strides = array<i32>} : memref<1x1x1xf32, #tpu.memory_space<vmem>>, vector<1x1x1xf32>,
      %c0_38 = arith.constant 0 : index
      %c0_39 = arith.constant 0 : index
      %58 = vector.load %arg11[%c0_38, %c0_39] : memref<1x32xf32, #tpu.memory_space<vmem>>, vector<1x32xf32>
      %59 = vector.shape_cast %58 : vector<1x32xf32> to vector<1x1x32xf32>
      %c0_40 = arith.constant 0 : index
      %c0_41 = arith.constant 0 : index
      %c0_42 = arith.constant 0 : index
      %60 = vector.load %arg8[%c0_40, %c0_41, %c0_42] : memref<1x1x32xf32, #tpu.memory_space<vmem>>, vector<1x1x32xf32>
      tpu.vector_store %arg8[%c0_40, %c0_41, %c0_42], %59 {strides = array<i32>} : memref<1x1x32xf32, #tpu.memory_space<vmem>>, vector<1x1x32xf32>,
    } else {
    }
    return
  }
  func.func @transform_0(%arg0: i32, %arg1: i32) -> (i32, i32) {
    %c4_i32 = arith.constant 4 : i32
    %0 = arith.muli %arg0, %c4_i32 : i32
    %1 = arith.addi %0, %arg1 : i32
    %c0_i32 = arith.constant 0 : i32
    %c0_i32_0 = arith.constant 0 : i32
    return %1, %c0_i32 : i32, i32
  }
  func.func @transform_1(%arg0: i32, %arg1: i32) -> (i32, i32) {
    %c0_i32 = arith.constant 0 : i32
    %c0_i32_0 = arith.constant 0 : i32
    %c0_i32_1 = arith.constant 0 : i32
    return %c0_i32, %c0_i32_0 : i32, i32
  }
  func.func @transform_2(%arg0: i32, %arg1: i32) -> (i32, i32) {
    %c0_i32 = arith.constant 0 : i32
    %c0_i32_0 = arith.constant 0 : i32
    %c0_i32_1 = arith.constant 0 : i32
    return %c0_i32, %c0_i32_0 : i32, i32
  }
  func.func @transform_3(%arg0: i32, %arg1: i32) -> (i32, i32) {
    %c0_i32 = arith.constant 0 : i32
    %c0_i32_0 = arith.constant 0 : i32
    %c0_i32_1 = arith.constant 0 : i32
    return %c0_i32, %c0_i32_0 : i32, i32
  }
  func.func @transform_4(%arg0: i32, %arg1: i32) -> (i32, i32, i32) {
    %c0_i32 = arith.constant 0 : i32
    %c0_i32_0 = arith.constant 0 : i32
    %c0_i32_1 = arith.constant 0 : i32
    return %arg0, %c0_i32, %c0_i32_0 : i32, i32, i32
  }
  func.func @transform_5(%arg0: i32, %arg1: i32) -> (i32, i32, i32) {
    %c0_i32 = arith.constant 0 : i32
    %c0_i32_0 = arith.constant 0 : i32
    %c0_i32_1 = arith.constant 0 : i32
    return %arg0, %c0_i32, %c0_i32_0 : i32, i32, i32
  }
  func.func @transform_6(%arg0: i32, %arg1: i32) -> (i32, i32, i32) {
    %c0_i32 = arith.constant 0 : i32
    %c0_i32_0 = arith.constant 0 : i32
    %c0_i32_1 = arith.constant 0 : i32
    return %arg0, %c0_i32, %c0_i32_0 : i32, i32, i32
  }
}

</mosaic_0001>

<bundles_post_ra>
// kernel: tpu_custom_call.1
= control target key start
LH: loop header
LB: loop body
LE: loop exit
PB: predicated region body
PF: predicated region fallthrough
CT: control target
= control target key end

     0   :  { %12 = vsyncpa [#allocation6], 0  ;;  %s1120_s0 = inlined_call_operand.vmem [shape: f32[64,32], index: 0, kind: input, shape index: {}]   ;;  %s1121_s1 = inlined_call_operand.vmem [shape: f32[32,64], index: 1, kind: input, shape index: {}]   ;;  %s1122_s2 = inlined_call_operand.vmem [shape: f32[1,64], index: 2, kind: input, shape index: {}]   ;;  %s1123_s3 = inlined_call_operand.vmem [shape: f32[1,32], index: 3, kind: input, shape index: {}]   ;;  %s1124_s4 = inlined_call_operand.hbm [shape: f32[1,1,1], index: 4, kind: output, shape index: {0}]   ;;  %s1125_s5 = inlined_call_operand.hbm [shape: f32[1,1,1], index: 5, kind: output, shape index: {1}]   ;;  %s1126_s6 = inlined_call_operand.hbm [shape: f32[1,1,32], index: 6, kind: output, shape index: {2}]  }
   0x1   :  { %13 = vsyncpa [#allocation8], 0  ;;  %s990_s21 = smov 0   ;;  %s992_s22 = smov 0  }
   0x2   :  { %s994_s23 = smov 0  }
   0x3 LB: > { %s702_s24 = sadd.s32 4294967295, %s943_s23   ;;  %s28_s25 = sadd.s32 1, %s939_s22  ;;  %s943_s23 = sphi %s994_s23, %s19_s23   ;;  %s939_s22 = sphi %s992_s22, %s1129_s22   ;;  %s935_s21 = sphi %s990_s21, %s1128_s21  }
   0x4   : > { %p29_p0 = scmp.ge.s32.totalorder %s28_s25, 4  ;;  %p705_p1 = scmp.ge.s32.totalorder %s943_s23, 1 }
   0x5   : > { %p240_p2 = scmp.lt.s32.totalorder %s943_s23, 5 }
   0x6   : > { %s1131_s25 = smov (%p29_p0, %s28_s25), 0 }
   0x7   : > { %p241_p3 = pnand %p705_p1, %p240_p2 }
   0x8   : > { %s706_s26 = sshll.u32 (!%p241_p3), %s935_s21, 1  ;;  %p708_p5 = scmp.ne.s32.totalorder (!%p241_p3), %s935_s21, 0 }
   0x9   : > { %244 = sbr.rel (%p241_p3) target bundleno = 997 (0x3e5), region = 36  ;;  %p270_p4 = scmp.lt.s32.totalorder (!%p241_p3), %s706_s26, 7 }
  0x10   : > { %s1133_s26 = smov (!%p270_p4, %s706_s26), 7  ;;  %280 = sbr.rel (%p708_p5) target bundleno = 23 (0x17), region = 40 }
  0x11   : > { %s707_s27 = sshll.u32 %s1133_s26, 3  ;;  %vm281_vm0 = vcmask (!%p708_p5), 0   ;;  %vm284_vm1 = vcmask (!%p708_p5), 253952   ;;  %v945_v0 = vmov (!%p708_p5), -inf   ;;  %v946_v1 = vmov (!%p708_p5), 0.0  }
  0x12   : > { %s273_s30 = scalar_lea.vmem %s1120_s0, %s707_s27  ;;  %282 = vst.msk [vmem:[#allocation2] sm:$0x1] (!%p708_p5), %vm281_vm0, %v945_v0  ;;  %283 = vst.msk [vmem:[#allocation3] sm:$0x1] (!%p708_p5), %vm281_vm0, %v946_v1 }
  0x13   : > { %285 = vst.msk [vmem:[#allocation4] sm:$0x1] (!%p708_p5), %vm284_vm1, %v946_v1 }
  0x17 PF: > { %v288_v2 = vld [vmem:[%s1121_s1] sm:$0xff]  ;;  %v289_v3 = vld [vmem:[%s1121_s1 + $0x8] sm:$0xff]  ;;  %v290_v4 = vld [vmem:[%s1121_s1 + $0x10] sm:$0xff]  ;;  %vm299_vm2 = vcmask 261120   ;;  %s947_s17 = smov 96   ;;  %v948_v34 = vmov 0   ;;  %v435_v41 = vlaneseq }
  0x18   : > { %v752_v5 = vpack.c.bf16 %v289_v3, %v288_v2  ;;  %v291_v6 = vld [vmem:[%s1121_s1 + $0x18] sm:$0xff]  ;;  %v286_v7 = vld [vmem:[%s273_s30] sm:$0xff]  ;;  %v287_v9 = vld [vmem:[%s273_s30 + $0x8] sm:$0xff]  ;;  %815 = vset.pattern.permute.xlu1 %v948_v34  ;;  %v949_v36 = vmov 0.0|0.0   ;;  %vm459_vm3 = vcmask 0   ;;  %vm448_vm5 = vcmask 7168  }
  0x19   : > { %v756_v8 = vpack.c.bf16 %v291_v6, %v290_v4  ;;  %742 = vmatprep.mubr.msk.f32.mxu0 %vm299_vm2, %v286_v7  ;;  %v709_v10 = vld [vmem:[%s1122_s2] ss:$0 sm:$0xff]  ;;  %v761_v35 = vpack.c.bf16 %v287_v9, %v286_v7  ;;  %760 = vmatprep.subr.bf16.mxu1 %v949_v36  ;;  %v436_v44 = vshrl.u32 %v435_v41, 7  ;;  %vm950_vm6 = vmmov 0   ;;  %v446_v6 = vld [vmem:[#allocation3] sm:$0x1] }
  0x1a   : > { %753 = vmatprep.subr.bf16.mxu0 %v752_v5  ;;  %v714_v25 = vld [vmem:[%s1123_s3] ss:$0 sm:$0xff]  ;;  %v951_v63 = vmov 0.0   ;;  %vm493_vm7 = vcmask 130048   ;;  %vm579_vm8 = vcmask 253952   ;;  %p716_p6 = scmp.ne.s32.totalorder %s935_s21, 3 }
  0x1b   : > { %755 = vmatpush3.bf16.msra.mxu0 %v752_v5  ;;  %762 = vmatpush3.bf16.msra.mxu1 %v761_v35  ;;  %v420_v47 = vld [vmem:[#allocation2] sm:$0x1]  ;;  %v437_v48 = vsub.s32 0, %v436_v44 }
  0x1c   : > { %757 = vmatprep.subr.bf16.mxu0 %v756_v8  ;;  %749 = vmatprep.mubr.msk.f32.mxu1 %vm950_vm6, %v951_v63 }
  0x1f   : > { %759 = vmatpush3.bf16.msra.mxu0 %v756_v8 }
  0x22   : > { %743 = vmatmul.mubr.msk.f32.vlgmr.msra.gmra.mrb[0].mxu0 %vm299_vm2, %v287_v9 }
  0xf5   : > { %v744_v11 = vpop.f32.mrb[0].mxu0 }
  0xf6   : > { %v378_v12 = vadd.f32 %v744_v11, %v709_v10  ;;  %v372_v13 = vpop.f32.mrb[1].mxu0 }
  0xf7   : > { %v373_v14 = vadd.f32 %v709_v10, %v372_v13 }
  0xf8   : > { %v713_v15 = vmul.f32 -1.442695, %v378_v12 }
  0xf9   : > { %v712_v16 = vmul.f32 -1.442695, %v373_v14 }
  0xfa   : > { %817 = vpow2.f32 %v713_v15 }
  0xfb   : > { %819 = vpow2.f32 %v712_v16 }
 0x104   : > { %v818_v17 = vpop.eup %817 }
 0x105   : > { %v820_v18 = vpop.eup %819  ;;  %v390_v20 = vadd.f32 1.0, %v818_v17 }
 0x106   : > { %v389_v19 = vadd.f32 1.0, %v820_v18 }
 0x108   : > { %821 = vrcp.f32 %v389_v19 }
 0x109   : > { %823 = vrcp.f32 %v390_v20 }
 0x10a   : > { %825 = vtanh.f32 %v373_v14  ;;  %v567_v14 = vld [vmem:[#allocation4] sm:$0x1] }
 0x10b   : > { %827 = vtanh.f32 %v378_v12 }
 0x112   : > { %v822_v21 = vpop.eup %821 }
 0x113   : > { %397 = vrot.lane.b32.xlu0 %v822_v21, %s947_s17  ;;  %v824_v22 = vpop.eup %823 }
 0x114   : > { %v826_v23 = vpop.eup %825 }
 0x115   : > { %v828_v28 = vpop.eup %827 }
 0x117   : > { %399 = vrot.lane.b32.xlu0 %v824_v22, %s947_s17 }
 0x185   : > { %v398_v24 = vpop.permute.xlu0 %397 }
 0x186   : > { %v403_v26 = vmul.f32 %v826_v23, %v398_v24 }
 0x188   : > { %v412_v27 = vmul.f32 %v714_v25, %v403_v26 }
 0x189   : > { %v400_v29 = vpop.permute.xlu0 %399 }
 0x18a   : > { %v404_v30 = vmul.f32 %v828_v28, %v400_v29  ;;  %v414_v31 = vsel %vm299_vm2, %v412_v27, 0.0 }
 0x18b   : > { %415 = vadd.xlane.f32.xlu1 %v414_v31 }
 0x18c   : > { %v413_v32 = vmul.f32 %v714_v25, %v404_v30 }
 0x18e   : > { %v417_v33 = vsel %vm299_vm2, %v413_v32, 0.0 }
 0x18f   : > { %418 = vadd.xlane.f32.xlu1 %v417_v33 }
 0x218   : > { %v416_v37 = vpop.xlane.xlu1 %415 }
 0x21c   : > { %v419_v38 = vpop.xlane.xlu1 %418 }
 0x21d   : > { %v421_v39 = vmax.f32 %v416_v37, %v419_v38 }
 0x21f   : > { %v422_v40 = vrot.slane %v421_v39, 4 }
 0x221   : > { %v423_v42 = vmax.f32 %v421_v39, %v422_v40 }
 0x223   : > { %v424_v43 = vrot.slane %v423_v42, 2 }
 0x225   : > { %v425_v45 = vmax.f32 %v423_v42, %v424_v43 }
 0x227   : > { %v426_v46 = vrot.slane %v425_v45, 1 }
 0x229   : > { %v427_v49 = vmax.f32 %v425_v45, %v426_v46 }
 0x22b   : > { %v428_v50 = vmax.f32 %v420_v47, %v427_v49 }
 0x22d   : > { %v438_v51 = vrot.slane %v428_v50, %v437_v48  ;;  %v430_v52 = vsub.f32 %v420_v47, %v428_v50  ;;  %581 = vst.msk [vmem:[#allocation2] sm:$0x1] %vm459_vm3, %v428_v50  ;;  %vm429_vm4 = vcmp.eq.f32.partialorder %v428_v50, -inf }
 0x22f   : > { %v440_v53 = vsub.f32 %v416_v37, %v438_v51  ;;  %v441_v54 = vsub.f32 %v419_v38, %v438_v51  ;;  %v431_v55 = vmul.f32 1.442695, %v430_v52 }
 0x231   : > { %v442_v56 = vmul.f32 1.442695, %v440_v53  ;;  %v444_v57 = vmul.f32 1.442695, %v441_v54  ;;  %829 = vpow2.f32 %v431_v55 }
 0x233   : > { %831 = vpow2.f32 %v442_v56 }
 0x234   : > { %833 = vpow2.f32 %v444_v57  ;;  %v586_v19 = vld [vmem:[#allocation2] sm:$0x1] (!%p716_p6) }
 0x235   : > { %587 = vst.msk [vmem:[#allocation5] sm:$0x1] (!%p716_p6), %vm459_vm3, %v586_v19 }
 0x23b   : > { %v830_v58 = vpop.eup %829 }
 0x23c   : > { %v433_v59 = vsel %vm429_vm4, 0.0, %v830_v58 }
 0x23d   : > { %v832_v60 = vpop.eup %831  ;;  %570 = vperm.xlu1 %815, %v433_v59   ;;  %v447_v9 = vmul.f32 %v446_v6, %v433_v59 }
 0x23e   : > { %v834_v61 = vpop.eup %833  ;;  %v449_v62 = vsel %vm448_vm5, %v832_v60, 0.0  ;;  %461 = vxpose.xlu0.b32.start [1/2] (short) (narrow) %v832_v60, 8 }
 0x23f   : > { %v450_v0 = vsel %vm448_vm5, %v834_v61, 0.0 }
 0x240   : > { %v451_v1 = vadd.f32 %v450_v0, %v449_v62 }
 0x242   : > { %v452_v2 = vrot.slane %v451_v1, 4  ;;  %462 = vxpose.xlu0.b32.end [2/2] (short) (narrow) %v834_v61, 8 }
 0x244   : > { %v453_v3 = vadd.f32 %v452_v2, %v451_v1 }
 0x246   : > { %v454_v4 = vrot.slane %v453_v3, 2 }
 0x248   : > { %v455_v5 = vadd.f32 %v454_v4, %v453_v3 }
 0x24a   : > { %v456_v7 = vrot.slane %v455_v5, 1 }
 0x24c   : > { %v457_v8 = vadd.f32 %v456_v7, %v455_v5 }
 0x24e   : > { %v458_v10 = vadd.f32 %v457_v8, %v447_v9 }
 0x250   : > { %460 = vst.msk [vmem:[#allocation3] sm:$0x1] %vm459_vm3, %v458_v10 }
 0x257   : > { %v588_v20 = vld [vmem:[#allocation3] sm:$0x1] (!%p716_p6) }
 0x258   : > { %589 = vst.msk [vmem:[#allocation7] sm:$0x1] (!%p716_p6), %vm459_vm3, %v588_v20 }
 0x26b   : > { %816 = vset.pattern.permute.xlu0 %v948_v34 }
 0x2bc   : > { %v571_v12 = vpop.permute.xlu1 %570 }
 0x2bd   : > { %v576_v13 = vrot.slane %v571_v12, %v437_v48 }
 0x2be   : > { %v477_v11 = vpop.trf.xlu0 }
 0x2bf   : > { %750 = vmatmul.mubr.msk.f32.vlgmr.msra.gmra.mrb[0].mxu1 %vm493_vm7, %v477_v11  ;;  %v577_v15 = vmul.f32 %v576_v13, %v567_v14 }
 0x38f   : > { %585 = sbr.rel (%p716_p6) target bundleno = 926 (0x39e), region = 44 }
 0x392   : > { %v563_v16 = vpop.f32.mrb[0].mxu1 }
 0x393   : > { %v578_v17 = vadd.f32 %v577_v15, %v563_v16  ;;  %v751_v18 = vpop.f32.mrb[1].mxu1 }
 0x395   : > { %580 = vst.msk [vmem:[#allocation4] sm:$0x1] %vm579_vm8, %v578_v17 }
 0x39c   : > { %v590_v21 = vld [vmem:[#allocation4] sm:$0x1] }
 0x39d   : > { %591 = vst.msk [vmem:[#allocation9] sm:$0x1] %vm579_vm8, %v590_v21 }
 0x39e PF: > { %p1045_p7 = scmp.eq.s32.totalorder %s702_s24, 3  ;;  %s952_s26 = smov [#allocation7]  }
 0x39f   : > { %s614_s27 = sshll.u32 %s952_s26, 4  ;;  %s615_s27 = int_to_ptr.vmem [resolvable:$true] %s614_s27 }
 0x3a0   : > { %s835_s21 = scalar_lea.vmem %s615_s27, 16  ;;  %s841_s28 = scalar_lea.vmem %s615_s27, 32 }
 0x3a1   : > { %p836_p8 = scmp.ne.s32.totalorder %s615_s27, %s835_s21  ;;  %p842_p11 = scmp.lt.s32.totalorder %s615_s27, %s615_s27 }
 0x3a2   : > { %p843_p12 = scmp.lt.s32.totalorder %s841_s28, %s835_s21 }
 0x3a3   : > { %p837_p9 = pnand %p836_p8, %p1045_p7 }
 0x3a4   : > { %p844_p13 = por %p843_p12, %p842_p11 }
 0x3a5   : > { %p838_p10 = pneg %p837_p9 }
 0x3a7   : > { %p845_p0 = pnand %p844_p13, %p838_p10 }
 0x3a9   : > { %848 = shalt.err (!%p845_p0)
}
 0x3aa   : > { %s849_s30 = scalar_lea.hbm %s1125_s5, 16 }
 0x3ab   : > { %p850_p1 = scmp.ne.s32.totalorder %s1125_s5, %s849_s30  ;;  %p855_p4 = scmp.lt.u32.totalorder %s849_s30, %s1125_s5 }
 0x3ad   : > { %p851_p2 = pnand %p850_p1, %p1045_p7 }
 0x3af   : > { %p852_p3 = pneg %p851_p2 }
 0x3b1   : > { %p857_p5 = pnand %p855_p4, %p852_p3 }
 0x3b3   : > { %860 = shalt.err (!%p857_p5)
}
 0x3b4   : > { %766 = dma.vmem_to_hbm [thread:$0]  (%p1045_p7), %s615_s27, 16, %s1125_s5, [#allocation8]  }
 0x3b5   : > { %s953_s13 = smov [#allocation5]   ;;  %s954_s15 = smov [#allocation9]  }
 0x3b6   : > { %s601_s14 = sshll.u32 %s953_s13, 4  ;;  %s627_s16 = sshll.u32 %s954_s15, 4  ;;  %s602_s14 = int_to_ptr.vmem [resolvable:$true] %s601_s14  ;;  %s628_s16 = int_to_ptr.vmem [resolvable:$true] %s627_s16 }
 0x3b7   : > { %s861_s17 = scalar_lea.vmem %s602_s14, 16  ;;  %s867_s18 = scalar_lea.vmem %s602_s14, 32 }
 0x3b8   : > { %p862_p6 = scmp.ne.s32.totalorder %s602_s14, %s861_s17  ;;  %p868_p10 = scmp.lt.s32.totalorder %s602_s14, %s602_s14 }
 0x3b9   : > { %p869_p11 = scmp.lt.s32.totalorder %s867_s18, %s861_s17 }
 0x3ba   : > { %p863_p8 = pnand %p862_p6, %p1045_p7 }
 0x3bb   : > { %p870_p12 = por %p869_p11, %p868_p10 }
 0x3bc   : > { %p864_p9 = pneg %p863_p8 }
 0x3be   : > { %p871_p13 = pnand %p870_p12, %p864_p9 }
 0x3c0   : > { %874 = shalt.err (!%p871_p13)
}
 0x3c1   : > { %s875_s27 = scalar_lea.hbm %s1124_s4, 16 }
 0x3c2   : > { %p876_p0 = scmp.ne.s32.totalorder %s1124_s4, %s875_s27  ;;  %p881_p3 = scmp.lt.u32.totalorder %s875_s27, %s1124_s4 }
 0x3c4   : > { %p877_p1 = pnand %p876_p0, %p1045_p7 }
 0x3c6   : > { %p878_p2 = pneg %p877_p1 }
 0x3c8   : > { %p883_p4 = pnand %p881_p3, %p878_p2 }
 0x3ca   : > { %886 = shalt.err (!%p883_p4)
}
 0x3cb   : > { %764 = dma.vmem_to_hbm [thread:$0]  (%p1045_p7), %s602_s14, 16, %s1124_s4, [#allocation6]  }
 0x3cc   : > { %s887_s8 = scalar_lea.vmem %s628_s16, 16  ;;  %s893_s9 = scalar_lea.vmem %s628_s16, 32 }
 0x3cd   : > { %p888_p5 = scmp.ne.s32.totalorder %s628_s16, %s887_s8  ;;  %p894_p9 = scmp.lt.s32.totalorder %s628_s16, %s628_s16 }
 0x3ce   : > { %p895_p10 = scmp.lt.s32.totalorder %s893_s9, %s887_s8 }
 0x3cf   : > { %p889_p6 = pnand %p888_p5, %p1045_p7 }
 0x3d0   : > { %p896_p11 = por %p895_p10, %p894_p9 }
 0x3d1   : > { %p890_p8 = pneg %p889_p6 }
 0x3d3   : > { %p897_p12 = pnand %p896_p11, %p890_p8 }
 0x3d5   : > { %900 = shalt.err (!%p897_p12)
}
 0x3d6   : > { %s901_s12 = scalar_lea.hbm %s1126_s6, 16 }
 0x3d7   : > { %p902_p13 = scmp.ne.s32.totalorder %s1126_s6, %s901_s12  ;;  %p907_p2 = scmp.lt.u32.totalorder %s901_s12, %s1126_s6 }
 0x3d9   : > { %p903_p0 = pnand %p902_p13, %p1045_p7 }
 0x3db   : > { %p904_p1 = pneg %p903_p0 }
 0x3dd   : > { %p909_p3 = pnand %p907_p2, %p904_p1 }
 0x3df   : > { %912 = shalt.err (!%p909_p3)
}
 0x3e0   : > { %768 = dma.vmem_to_hbm [thread:$0]  (%p1045_p7), %s628_s16, 16, %s1126_s6, [#allocation8]  }
 0x3e1   : > { %926 = dma.done.wait (%p1045_p7), [#allocation6], 16  }
 0x3e2   : > { %928 = vsyncadd (%p1045_p7), [#allocation6], 4294967280 }
 0x3e3   : > { %930 = dma.done.wait (%p1045_p7), [#allocation8], 32  }
 0x3e4   : > { %932 = vsyncadd (%p1045_p7), [#allocation8], 4294967264 }
 0x3e5 PF: > { %s19_s23 = sadd.s32 1, %s943_s23   ;;  %s1128_s21 = smov %s939_s22 }
 0x3e6   : > { %p16_p4 = scmp.ge.s32.totalorder %s19_s23, 6   ;;  %s1129_s22 = smov %s1131_s25 }
 0x3e8   :  { %18 = sbr.rel (!%p16_p4) target bundleno = 3 (0x3), region = 90 }
 0x3ef   :  { %648 = vsyncpa [#allocation6], 1 }
 0x3f0   :  { %650 = vsyncpa [#allocation6 + $0x1], 1 }
 0x3f1   :  { %651 = vsyncpa [#allocation8], 1 }

</bundles_post_ra>
